<compile_context>
chip_gen: v6e
topology: v6e:2x2x1
jax: 0.10.0
libtpu: 0.0.40
codegen_flags: <defaults>
</compile_context>

<pallas_src>
import functools

import jax
import jax.numpy as jnp
from jax import lax
from jax.experimental import pallas as pl
from jax.experimental.pallas import tpu as pltpu


def _round_up(x, m):
    return ((x + m - 1) // m) * m


_IN_BYTES = 2    # bf16 matmul operands
_OUT_BYTES = 4   # f32 output / accumulator


# ------------------------------------------------------------------ Pallas kernels

def _conv_mm_kernel_single(p_ref, w_ref, b_ref, o_ref):
    """Full K in one tile: o = P @ W + b.  No scratch, no accumulator RMW."""
    o_ref[...] = (jnp.dot(p_ref[...], w_ref[...],
                          preferred_element_type=jnp.float32)
                  + b_ref[...]).astype(o_ref.dtype)


def _conv_mm_kernel_ktiled(p_ref, w_ref, b_ref, o_ref, acc_ref):
    """K-tiled reduction: init acc with the first partial product (+bias), += after."""
    k = pl.program_id(2)
    prod = jnp.dot(p_ref[...], w_ref[...], preferred_element_type=jnp.float32)

    @pl.when(k == 0)
    def _init():
        acc_ref[...] = prod + b_ref[...]

    @pl.when(k > 0)
    def _accum():
        acc_ref[...] += prod

    @pl.when(k == pl.num_programs(2) - 1)
    def _finalize():
        o_ref[...] = acc_ref[...].astype(o_ref.dtype)


# ------------------------------------------------------------------ tiling / VMEM

def _vmem_capacity_bytes():
    try:
        return int(pltpu.get_tpu_info().vmem_capacity_bytes)
    except Exception:
        return 64 * 2**20   # conservative fallback (v7x per-TensorCore VMEM)


def _select_tiles(M, K, Cout, vmem_capacity):
    """Pick (tm, tn, tk) and padded dims.  Sized against this chip's VMEM."""
    # --- Cout (lane axis): lane-dense, MXU-aligned; only tile when very wide.
    cout_pad = _round_up(Cout, 128)
    if cout_pad > 512:
        tn = 512
        cout_pad = _round_up(cout_pad, tn)
    else:
        tn = cout_pad
    n_steps = cout_pad // tn

    # --- K (reduction axis): untiled up to 2048 (typically K = kh*kw*Cin); when
    # tiled, tk is a multiple of 128 close to K / n_k so padding waste stays small.
    if K <= 2048:
        tk, k_pad, k_steps = K, K, 1
    else:
        k_steps = pl.cdiv(K, 2048)
        tk = _round_up(pl.cdiv(K, k_steps), 128)
        k_pad = tk * k_steps

    # --- M (sublane axis): biggest tile (up to 1024) fitting ~40% of physical VMEM.
    budget = (2 * vmem_capacity) // 5

    def vmem_need(tm):
        return (2 * tm * tk * _IN_BYTES                            # patch tiles (dbl-buf)
                + 2 * tk * tn * _IN_BYTES                          # weight tiles
                + 2 * tm * tn * _OUT_BYTES                         # output tiles
                + (tm * tn * _OUT_BYTES if k_steps > 1 else 0)     # f32 accumulator
                + 2 * tn * _OUT_BYTES)                             # bias

    tm_fit = 16
    for cand in (1024, 512, 256, 128, 64, 32, 16):
        if vmem_need(cand) <= budget:
            tm_fit = cand
            break

    m16 = _round_up(max(M, 1), 16)
    m_steps = pl.cdiv(m16, tm_fit)
    # Prefer >=2 (and even) M steps when M is large enough, so the "parallel"
    # axis can actually split across both TensorCores on v7x.
    if m_steps == 1 and m16 >= 256:
        m_steps = 2
    if m_steps > 1 and m_steps % 2 == 1:
        m_steps += 1
    tm = _round_up(pl.cdiv(M, m_steps), 16)
    m_pad = tm * m_steps

    return tm, tn, tk, m_pad, cout_pad, k_pad, m_steps, n_steps, k_steps, vmem_need(tm)


# ------------------------------------------------------------------ matmul driver

def _pallas_patch_matmul(patches, w_mat, bias, *, out_dtype):
    """patches: (M, K) bf16, w_mat: (K, Cout) bf16, bias: (Cout,) -> (M, Cout)."""
    M, K = patches.shape
    Cout = w_mat.shape[1]

    vmem_cap = _vmem_capacity_bytes()
    (tm, tn, tk, m_pad, cout_pad, k_pad,
     m_steps, n_steps, k_steps, need) = _select_tiles(M, K, Cout, vmem_cap)

    # Zero padding never changes the matmul result (padded rows are sliced off).
    if (m_pad, k_pad) != (M, K):
        patches = jnp.pad(patches, ((0, m_pad - M), (0, k_pad - K)))
    if (k_pad, cout_pad) != (K, Cout):
        w_mat = jnp.pad(w_mat, ((0, k_pad - K), (0, cout_pad - Cout)))
    bias2d = jnp.pad(bias.astype(jnp.float32), (0, cout_pad - Cout)).reshape(1, cout_pad)

    grid = (m_steps, n_steps, k_steps)
    in_specs = [
        pl.BlockSpec((tm, tk), lambda i, j, k: (i, k)),
        pl.BlockSpec((tk, tn), lambda i, j, k: (k, j)),
        pl.BlockSpec((1, tn), lambda i, j, k: (0, j)),
    ]
    out_spec = pl.BlockSpec((tm, tn), lambda i, j, k: (i, j))

    if k_steps == 1:
        kernel = _conv_mm_kernel_single
        scratch = []
    else:
        kernel = _conv_mm_kernel_ktiled
        scratch = [pltpu.VMEM((tm, tn), jnp.float32)]

    # Generation-aware scoped-VMEM request: ~2x the real double-buffered block
    # bytes, floored at 16 MiB, capped at 50% of this chip's physical VMEM
    # (64 MiB -> 32 MiB cap on v7x; 128 MiB -> 64 MiB cap on v5e/v6e).
    vmem_limit = int(min(max(2 * need, 16 * 2**20), vmem_cap // 2))

    out = pl.pallas_call(
        kernel,
        out_shape=jax.ShapeDtypeStruct((m_pad, cout_pad), out_dtype),
        grid_spec=pltpu.PrefetchScalarGridSpec(
            num_scalar_prefetch=0,
            grid=grid,
            in_specs=in_specs,
            out_specs=out_spec,
            scratch_shapes=scratch,
        ),
        compiler_params=pltpu.CompilerParams(
            # TODO(synk): evaluate pltpu.CORE_PARALLEL on the M axis (v7x).
            dimension_semantics=("parallel", "parallel", "arbitrary"),
            vmem_limit_bytes=vmem_limit,
        ),
    )(patches, w_mat, bias2d)

    return out[:M, :Cout]


# ------------------------------------------------------------------ ConvLayer forward

def _im2col_nhwc(x_nhwc, kh, kw, stride):
    """x_nhwc: (N, H, W, C) -> (N*Ho*Wo, kh*kw*C) with (kh, kw, c) minor ordering."""
    N, H, W, C = x_nhwc.shape
    Ho = (H - kh) // stride + 1
    Wo = (W - kw) // stride + 1
    cols = []
    for i in range(kh):
        for j in range(kw):
            cols.append(
                x_nhwc[:, i:i + stride * (Ho - 1) + 1:stride,
                          j:j + stride * (Wo - 1) + 1:stride, :])
    patches = jnp.concatenate(cols, axis=-1)          # (N, Ho, Wo, kh*kw*C)
    return patches.reshape(N * Ho * Wo, kh * kw * C), (N, Ho, Wo)


@functools.partial(jax.jit, static_argnames=("kernel_size", "stride", "padding",
                                             "padding_type"))
def conv_layer_forward(x_nchw, weight, bias, *, kernel_size=4, stride=2,
                       padding=0, padding_type="zero"):
    """Replicates ConvLayer.forward.

    x_nchw: (N, Cin, H, W); weight: (Cout, Cin, Kh, Kw) [PyTorch OIHW]; bias: (Cout,)
    """
    out_dtype = x_nchw.dtype
    compute_dtype = jnp.bfloat16

    # Same padding resolution as ConvLayer.__init__.
    pad = padding if padding > 0 else (kernel_size // 2 if stride == 1 else 0)

    # Cast to bf16 up front: halves every wrapper-side HBM pass (pad / transpose /
    # im2col patch materialization) and removes the old extra pad+astype copy.
    x = x_nchw.astype(compute_dtype)

    # forward(): explicit F.pad (reflect or zero) PLUS nn.Conv2d's own zero padding
    # of self.padding (the module applies both).  zero+zero collapses to one pad.
    if pad > 0:
        if padding_type == "reflect":
            x = jnp.pad(x, ((0, 0), (0, 0), (pad, pad), (pad, pad)), mode="reflect")
            zpad = pad
        elif padding_type == "zero":
            zpad = 2 * pad
        else:
            zpad = pad
        x = jnp.pad(x, ((0, 0), (0, 0), (zpad, zpad), (zpad, zpad)))

    # NCHW -> NHWC (channels on the lane axis) for im2col + the Pallas matmul.
    x_nhwc = jnp.transpose(x, (0, 2, 3, 1))
    kh = kw = kernel_size
    patches, (N, Ho, Wo) = _im2col_nhwc(x_nhwc, kh, kw, stride)

    Cout, Cin = weight.shape[0], weight.shape[1]
    # (Cout, Cin, Kh, Kw) -> (Kh, Kw, Cin, Cout) -> (Kh*Kw*Cin, Cout): matches
    # the (kh, kw, c)-minor patch ordering.
    w_mat = jnp.transpose(weight.astype(compute_dtype), (2, 3, 1, 0)).reshape(
        kh * kw * Cin, Cout)

    out_flat = _pallas_patch_matmul(patches, w_mat, bias, out_dtype=out_dtype)
    out = out_flat.reshape(N, Ho, Wo, Cout)
    return jnp.transpose(out, (0, 3, 1, 2))                     # back to NCHW


# ------------------------------------------------------------------ demo / check

if __name__ == "__main__":
    key = jax.random.PRNGKey(0)
    k_x, k_w, k_b, k_x2, k_w2, k_b2 = jax.random.split(key, 6)

    # --- Config 1: the module defaults (kernel_size=4, stride=2, padding=0, zero).
    N, Cin, H, W = 2, 4, 16, 16
    Cout, K, stride = 8, 4, 2

    x = jax.random.normal(k_x, (N, Cin, H, W), dtype=jnp.float32)
    fan_in = Cin * K * K
    bound = 1.0 / (fan_in ** 0.5)
    weight = jax.random.uniform(k_w, (Cout, Cin, K, K), jnp.float32, -bound, bound)
    bias = jax.random.uniform(k_b, (Cout,), jnp.float32, -bound, bound)

    y = conv_layer_forward(x, weight, bias, kernel_size=K, stride=stride,
                           padding=0, padding_type="zero")
    y = jax.block_until_ready(y)
    assert y.shape == (N, Cout, 7, 7), y.shape

    # Reference A: bf16-operand conv with f32 accumulation (same numerics as kernel).
    y_ref_bf16 = lax.conv_general_dilated(
        x.astype(jnp.bfloat16), weight.astype(jnp.bfloat16),
        window_strides=(stride, stride), padding="VALID",
        dimension_numbers=("NCHW", "OIHW", "NCHW"),
        preferred_element_type=jnp.float32) + bias[None, :, None, None]
    err_bf16 = float(jnp.abs(y - y_ref_bf16).max())
    assert jnp.allclose(y, y_ref_bf16, atol=2e-3, rtol=2e-3), err_bf16

    # Reference B: full f32 conv (loose tolerance: bf16 operand quantization only).
    y_ref_f32 = lax.conv_general_dilated(
        x, weight, window_strides=(stride, stride), padding="VALID",
        dimension_numbers=("NCHW", "OIHW", "NCHW")) + bias[None, :, None, None]
    err_f32 = float(jnp.abs(y - y_ref_f32).max())
    assert jnp.allclose(y, y_ref_f32, atol=1e-1, rtol=1e-1), err_f32

    # --- Config 2: stride=1 / kernel=3 / reflect padding (exercises the padding
    # path: explicit reflect F.pad + Conv2d's own zero padding, both of size 1).
    Cout2, K2 = 6, 3
    x2 = jax.random.normal(k_x2, (N, Cin, H, W), dtype=jnp.float32)
    bound2 = 1.0 / ((Cin * K2 * K2) ** 0.5)
    w2 = jax.random.uniform(k_w2, (Cout2, Cin, K2, K2), jnp.float32, -bound2, bound2)
    b2 = jax.random.uniform(k_b2, (Cout2,), jnp.float32, -bound2, bound2)

    y2 = conv_layer_forward(x2, w2, b2, kernel_size=K2, stride=1,
                            padding=0, padding_type="reflect")
    y2 = jax.block_until_ready(y2)
    assert y2.shape == (N, Cout2, 18, 18), y2.shape

    xp = jnp.pad(x2, ((0, 0), (0, 0), (1, 1), (1, 1)), mode="reflect")
    xp = jnp.pad(xp, ((0, 0), (0, 0), (1, 1), (1, 1)))
    y2_ref = lax.conv_general_dilated(
        xp.astype(jnp.bfloat16), w2.astype(jnp.bfloat16),
        window_strides=(1, 1), padding="VALID",
        dimension_numbers=("NCHW", "OIHW", "NCHW"),
        preferred_element_type=jnp.float32) + b2[None, :, None, None]
    err2 = float(jnp.abs(y2 - y2_ref).max())
    assert jnp.allclose(y2, y2_ref, atol=2e-3, rtol=2e-3), err2

    print("KERNEL_OK")
</pallas_src>

<mosaic_0001>
module attributes {stable_mosaic.version = 11 : i64} {
  func.func @_conv_mm_kernel_single(%arg0: i32, %arg1: i32, %arg2: i32, %arg3: memref<112x64xbf16, #tpu.memory_space<vmem>>, %arg4: memref<64x128xbf16, #tpu.memory_space<vmem>>, %arg5: memref<1x128xf32, #tpu.memory_space<vmem>>, %arg6: memref<112x128xf32, #tpu.memory_space<vmem>>) attributes {dimension_semantics = [#tpu.dimension_semantics<parallel>, #tpu.dimension_semantics<parallel>, #tpu.dimension_semantics<arbitrary>], iteration_bounds = array<i64: 1, 1, 1>, scalar_prefetch = 0 : i64, scratch_operands = 0 : i64, tpu.core_type = #tpu.core_type<tc>, window_params = [{transform_indices = @transform_0, window_bounds = array<i64: 112, 64>}, {transform_indices = @transform_1, window_bounds = array<i64: 64, 128>}, {transform_indices = @transform_2, window_bounds = array<i64: 1, 128>}, {transform_indices = @transform_3, window_bounds = array<i64: 112, 128>}]} {
    %c0 = arith.constant 0 : index
    %c0_0 = arith.constant 0 : index
    %0 = vector.load %arg3[%c0, %c0_0] : memref<112x64xbf16, #tpu.memory_space<vmem>>, vector<112x64xbf16>
    %c0_1 = arith.constant 0 : index
    %c0_2 = arith.constant 0 : index
    %1 = vector.load %arg4[%c0_1, %c0_2] : memref<64x128xbf16, #tpu.memory_space<vmem>>, vector<64x128xbf16>
    %cst = arith.constant dense<0.000000e+00> : vector<112x128xf32>
    %2 = tpu.matmul %0, %1, %cst {dimension_numbers = #tpu.dot_dimension_numbers<[1], [0], [0], [1], [0, 0, 1, 1], [], []>} : vector<112x64xbf16>, vector<64x128xbf16>, vector<112x128xf32> -> vector<112x128xf32>
    %c0_3 = arith.constant 0 : index
    %c0_4 = arith.constant 0 : index
    %3 = vector.load %arg5[%c0_3, %c0_4] : memref<1x128xf32, #tpu.memory_space<vmem>>, vector<1x128xf32>
    %4 = vector.broadcast %3 : vector<1x128xf32> to vector<112x128xf32>
    %5 = arith.addf %2, %4 : vector<112x128xf32>
    %c0_5 = arith.constant 0 : index
    %c0_6 = arith.constant 0 : index
    %6 = vector.load %arg6[%c0_5, %c0_6] : memref<112x128xf32, #tpu.memory_space<vmem>>, vector<112x128xf32>
    tpu.vector_store %arg6[%c0_5, %c0_6], %5 {strides = array<i32>} : memref<112x128xf32, #tpu.memory_space<vmem>>, vector<112x128xf32>,
    return
  }
  func.func @transform_0(%arg0: i32, %arg1: i32, %arg2: i32) -> (i32, i32) {
    %c0_i32 = arith.constant 0 : i32
    return %arg0, %arg2 : i32, i32
  }
  func.func @transform_1(%arg0: i32, %arg1: i32, %arg2: i32) -> (i32, i32) {
    %c0_i32 = arith.constant 0 : i32
    return %arg2, %arg1 : i32, i32
  }
  func.func @transform_2(%arg0: i32, %arg1: i32, %arg2: i32) -> (i32, i32) {
    %c0_i32 = arith.constant 0 : i32
    %c0_i32_0 = arith.constant 0 : i32
    return %c0_i32, %arg1 : i32, i32
  }
  func.func @transform_3(%arg0: i32, %arg1: i32, %arg2: i32) -> (i32, i32) {
    %c0_i32 = arith.constant 0 : i32
    return %arg0, %arg1 : i32, i32
  }
}

</mosaic_0001>

<bundles_post_ra>
// kernel: conv_layer_forward.1
= control target key start
LH: loop header
LB: loop body
LE: loop exit
PB: predicated region body
PF: predicated region fallthrough
CT: control target
= control target key end

     0   :  { %v319_v0 = vmov 0.0   ;;  %vm320_vm0 = vmmov 0   ;;  %vm103_vm1 = vcmask 523264   ;;  %s433_s1 = inlined_call_operand.vmem [shape: bf16[64,128], index: 1, kind: input, shape index: {}]   ;;  %s434_s0 = inlined_call_operand.vmem [shape: bf16[112,64], index: 0, kind: input, shape index: {}]   ;;  %s435_s2 = inlined_call_operand.vmem [shape: f32[1,128], index: 2, kind: input, shape index: {}]   ;;  %s436_s3 = inlined_call_operand.vmem [shape: f32[112,128], index: 3, kind: output, shape index: {}]  }
   0x1   :  { %262 = vmatprep.subr.bf16.mxu0 %v319_v0  ;;  %v308_v1 = vld [vmem:[%s433_s1 + $0x18] sm:$0xff]   ;;  %298 = vmatprep.subr.bf16.mxu1 %v319_v0  ;;  %v309_v2 = vld [vmem:[%s433_s1 + $0x10] sm:$0xff]   ;;  %v310_v3 = vld [vmem:[%s433_s1 + $0x8] sm:$0xff]  }
   0x2   :  { %270 = vmatprep.mubr.msk.bf16.mxu0 %vm320_vm0, %v319_v0  ;;  %286 = vmatprep.mubr.msk.bf16.mxu1 %vm320_vm0, %v319_v0  ;;  %v311_v4 = vld [vmem:[%s433_s1] sm:$0xff]   ;;  %v314_v7 = vld [vmem:[%s434_s0 + $0x8] sm:$0xff]   ;;  %v316_v9 = vld [vmem:[%s434_s0 + $0x10] sm:$0xff]  }
   0x3   :  { %263 = vmatpush3.bf16.msra.mxu0 %v308_v1  ;;  %302 = vmatpush3.bf16.msra.mxu1 %v308_v1  ;;  %v312_v5 = vld [vmem:[%s434_s0] sm:$0xff]   ;;  %v315_v8 = vld [vmem:[%s434_s0 + $0x28] sm:$0xff]   ;;  %v317_v10 = vld [vmem:[%s434_s0 + $0x30] sm:$0xff]  }
   0x4   :  { %264 = vmatprep.subr.bf16.mxu0 %v319_v0  ;;  %299 = vmatprep.subr.bf16.mxu1 %v319_v0  ;;  %v313_v6 = vld [vmem:[%s434_s0 + $0x20] sm:$0xff]   ;;  %v318_v11 = vld [vmem:[%s434_s0 + $0x18] sm:$0xff]  }
   0x5   :  { %v232_v12 = vld [vmem:[%s435_s2] ss:$0 sm:$0xff] }
   0x7   :  { %265 = vmatpush3.bf16.msra.mxu0 %v309_v2  ;;  %303 = vmatpush3.bf16.msra.mxu1 %v309_v2 }
   0x8   :  { %266 = vmatprep.subr.bf16.mxu0 %v319_v0  ;;  %300 = vmatprep.subr.bf16.mxu1 %v319_v0 }
   0xb   :  { %267 = vmatpush3.bf16.msra.mxu0 %v310_v3  ;;  %304 = vmatpush3.bf16.msra.mxu1 %v310_v3 }
   0xc   :  { %268 = vmatprep.subr.bf16.mxu0 %v319_v0  ;;  %301 = vmatprep.subr.bf16.mxu1 %v319_v0 }
   0xf   :  { %269 = vmatpush3.bf16.msra.mxu0 %v311_v4  ;;  %305 = vmatpush3.bf16.msra.mxu1 %v311_v4 }
  0x12   :  { %271 = vmatmul.mubr.msk.bf16.vlgmr.msra.gmra.mxu0 %vm103_vm1, %v312_v5  ;;  %287 = vmatmul.mubr.msk.bf16.vlgmr.msra.gmra.mxu1 %vm103_vm1, %v313_v6 }
  0x13   :  { %274 = vmatprep.mubr.msk.bf16.mxu0 %vm320_vm0, %v319_v0  ;;  %290 = vmatprep.mubr.msk.bf16.mxu1 %vm320_vm0, %v319_v0 }
  0x1a   :  { %275 = vmatmul.mubr.msk.bf16.gmra.mxu0 %vm103_vm1, %v314_v7  ;;  %291 = vmatmul.mubr.msk.bf16.gmra.mxu1 %vm103_vm1, %v315_v8 }
  0x1b   :  { %278 = vmatprep.mubr.msk.bf16.mxu0 %vm320_vm0, %v319_v0  ;;  %294 = vmatprep.mubr.msk.bf16.mxu1 %vm320_vm0, %v319_v0 }
  0x22   :  { %279 = vmatmul.mubr.msk.bf16.gmra.mxu0 %vm103_vm1, %v316_v9  ;;  %295 = vmatmul.mubr.msk.bf16.gmra.mxu1 %vm103_vm1, %v317_v10 }
  0x23   :  { %282 = vmatprep.mubr.msk.bf16.mxu0 %vm320_vm0, %v319_v0 }
  0x2a   :  { %283 = vmatmul.mubr.msk.bf16.gmra.mxu0 %vm103_vm1, %v318_v11 }
  0xd2   :  { %v159_v13 = vpop.f32.mrf.mxu0  ;;  %v191_v14 = vpop.f32.mrf.mxu1 }
  0xd3   :  { %v160_v15 = vadd.f32 %v232_v12, %v159_v13  ;;  %v192_v16 = vadd.f32 %v232_v12, %v191_v14 }
  0xd4   :  { %v272_v17 = vpop.f32.mrf.mxu0  ;;  %v288_v18 = vpop.f32.mrf.mxu1 }
  0xd5   :  { %214 = vst [vmem:[%s436_s3] sm:$0xff] %v160_v15  ;;  %222 = vst [vmem:[%s436_s3 + $0x40] sm:$0xff] %v192_v16 }
  0xd6   :  { %v162_v19 = vpop.f32.mrf.mxu0  ;;  %v194_v20 = vpop.f32.mrf.mxu1 }
  0xd7   :  { %v163_v21 = vadd.f32 %v232_v12, %v162_v19  ;;  %v195_v22 = vadd.f32 %v232_v12, %v194_v20 }
  0xd8   :  { %v273_v23 = vpop.f32.mrf.mxu0  ;;  %v289_v24 = vpop.f32.mrf.mxu1 }
  0xd9   :  { %215 = vst [vmem:[%s436_s3 + $0x8] sm:$0xff] %v163_v21  ;;  %223 = vst [vmem:[%s436_s3 + $0x48] sm:$0xff] %v195_v22 }
  0xda   :  { %v167_v25 = vpop.f32.mrf.mxu0  ;;  %v199_v26 = vpop.f32.mrf.mxu1 }
  0xdb   :  { %v168_v27 = vadd.f32 %v232_v12, %v167_v25  ;;  %v200_v28 = vadd.f32 %v232_v12, %v199_v26 }
  0xdc   :  { %v276_v29 = vpop.f32.mrf.mxu0  ;;  %v292_v30 = vpop.f32.mrf.mxu1 }
  0xdd   :  { %216 = vst [vmem:[%s436_s3 + $0x10] sm:$0xff] %v168_v27  ;;  %224 = vst [vmem:[%s436_s3 + $0x50] sm:$0xff] %v200_v28 }
  0xde   :  { %v170_v31 = vpop.f32.mrf.mxu0  ;;  %v202_v32 = vpop.f32.mrf.mxu1 }
  0xdf   :  { %v171_v33 = vadd.f32 %v232_v12, %v170_v31  ;;  %v203_v34 = vadd.f32 %v232_v12, %v202_v32 }
  0xe0   :  { %v277_v35 = vpop.f32.mrf.mxu0  ;;  %v293_v36 = vpop.f32.mrf.mxu1 }
  0xe1   :  { %217 = vst [vmem:[%s436_s3 + $0x18] sm:$0xff] %v171_v33  ;;  %225 = vst [vmem:[%s436_s3 + $0x58] sm:$0xff] %v203_v34 }
  0xe2   :  { %v175_v37 = vpop.f32.mrf.mxu0  ;;  %v207_v38 = vpop.f32.mrf.mxu1 }
  0xe3   :  { %v176_v39 = vadd.f32 %v232_v12, %v175_v37  ;;  %v208_v40 = vadd.f32 %v232_v12, %v207_v38 }
  0xe4   :  { %v280_v41 = vpop.f32.mrf.mxu0  ;;  %v296_v42 = vpop.f32.mrf.mxu1 }
  0xe5   :  { %218 = vst [vmem:[%s436_s3 + $0x20] sm:$0xff] %v176_v39  ;;  %226 = vst [vmem:[%s436_s3 + $0x60] sm:$0xff] %v208_v40 }
  0xe6   :  { %v178_v43 = vpop.f32.mrf.mxu0  ;;  %v210_v44 = vpop.f32.mrf.mxu1 }
  0xe7   :  { %v179_v45 = vadd.f32 %v232_v12, %v178_v43  ;;  %v211_v46 = vadd.f32 %v232_v12, %v210_v44 }
  0xe8   :  { %v281_v47 = vpop.f32.mrf.mxu0  ;;  %v297_v48 = vpop.f32.mrf.mxu1 }
  0xe9   :  { %219 = vst [vmem:[%s436_s3 + $0x28] sm:$0xff] %v179_v45  ;;  %227 = vst [vmem:[%s436_s3 + $0x68] sm:$0xff] %v211_v46 }
  0xea   :  { %v183_v49 = vpop.f32.mrf.mxu0 }
  0xeb   :  { %v184_v50 = vadd.f32 %v232_v12, %v183_v49 }
  0xec   :  { %v284_v51 = vpop.f32.mrf.mxu0 }
  0xed   :  { %220 = vst [vmem:[%s436_s3 + $0x30] sm:$0xff] %v184_v50 }
  0xee   :  { %v186_v52 = vpop.f32.mrf.mxu0 }
  0xef   :  { %v187_v53 = vadd.f32 %v232_v12, %v186_v52 }
  0xf0   :  { %v285_v54 = vpop.f32.mrf.mxu0 }
  0xf1   :  { %221 = vst [vmem:[%s436_s3 + $0x38] sm:$0xff] %v187_v53 }

</bundles_post_ra>
